<compile_context>
chip_gen: v5e
topology: v5e:2x2
jax: 0.10.0
libtpu: 0.0.40
codegen_flags: <defaults>
</compile_context>

<pallas_src>
import math
from functools import partial

import jax
import jax.numpy as jnp
from jax.experimental import pallas as pl
from jax.experimental.pallas import tpu as pltpu

PI = math.pi


def _dstft_kernel(N, F, pw, eps, use_bf16,
                  x_ref, w_ref, dft_ref, shc_ref, shs_ref,
                  real_ref, imag_ref, spec_ref):
    # x_ref:   (1, N, tT)  framed signal, frames on the lane axis
    # w_ref:   (N, tT)     Hann tapering window per (sample, frame)
    # dft_ref: (2N, N)     [cos(2*pi*f*n/N); -sin(2*pi*f*n/N)] stacked on rows
    # shc/shs: (N, tT)     fractional-index phase rotation per (freq, frame)
    xw = x_ref[0] * w_ref[...]                                        # (N, tT)
    dft = dft_ref[...]
    if use_bf16:
        # Optional MXU speedup (v5e/v6e/v7x run bf16 much faster); off by
        # default to keep exact f32 parity with the torch reference.
        xw_mm = xw.astype(jnp.bfloat16)
        dft = dft.astype(jnp.bfloat16)
    else:
        xw_mm = xw
    # single fused matmul: real rows [0:N], imag rows [N:2N]
    fused = jnp.dot(dft, xw_mm, preferred_element_type=jnp.float32)   # (2N, tT)
    rp = fused[:N]
    ip = fused[N:]
    shc = shc_ref[...]
    shs = shs_ref[...]
    real = rp * shc - ip * shs
    imag = rp * shs + ip * shc
    real_ref[0] = real.astype(real_ref.dtype)
    imag_ref[0] = imag.astype(imag_ref.dtype)
    mag = jnp.sqrt(real * real + imag * imag)
    if pw != 1.0:
        # pow lowers via exp(pw*log(mag)); mag can be exactly 0 on masked
        # edge frames, so guard the argument.
        mag = jnp.maximum(mag, 1e-30) ** pw
    spec_ref[0] = (mag[:F] + eps).astype(spec_ref.dtype)


def dstft_forward(x, *, support, stride, win_length,
                  pow=1.0, win_pow=1.0, use_bf16_matmul=False):
    """Forward pass of DSTFT (defaults): returns (spec, stft, real, imag, phase, aux)."""
    B, L = x.shape
    N = support
    F = 1 + N // 2
    T = 1 + int(math.floor((L - (N - 1) - 1) / stride))
    dtype = x.dtype

    # frame-tile (lane) size: multiple of 128, capped to keep padding waste low
    tT = min(256, pl.cdiv(T, 128) * 128)
    T_pad = pl.cdiv(T, tT) * tT

    # --- parameters, deterministically initialized exactly as __init__ does ---
    strides_p = jnp.full((1,), float(abs(stride)), dtype)          # stride_p=None
    win_len_p = jnp.full((1, 1), float(abs(win_length)), dtype)    # win_p=None
    win_pow_p = jnp.full((1, 1), float(abs(win_pow)), dtype)       # pow_p=None

    win_min, win_max = N / 20.0, float(N)
    stride_min, stride_max = 0.0, float(max(N, abs(stride)))

    actual_strides = jnp.clip(strides_p, stride_min, stride_max)   # (1,)
    actual_wl = jnp.clip(win_len_p, win_min, win_max)              # (1, 1)

    # --- frames / fractional indices (first_frame=False) ---
    exp_stride = jnp.broadcast_to(actual_strides, (T,))
    frames = jnp.concatenate(
        [jnp.zeros((1,), dtype), jnp.cumsum(exp_stride[1:])])      # (T,)
    idx_floor = jnp.floor(frames)
    idx_frac = (frames - idx_floor).astype(dtype)                  # (T,)
    idx_frac_p = jnp.pad(idx_frac, (0, T_pad - T))                 # (T_pad,)

    # --- framed signal with out-of-range masking, frames on lanes: (B, N, T) ---
    # TODO(synk): frame inside the kernel from a (1, L) block of x (scalar-
    # prefetched frame offsets) to avoid materializing the gathered frames in HBM.
    idx = (idx_floor.astype(jnp.int32)[None, :]
           + jnp.arange(N, dtype=jnp.int32)[:, None])              # (N, T)
    valid = (idx >= 0) & (idx < L)
    safe_idx = jnp.clip(idx, 0, L - 1)
    strided_nt = jnp.where(valid[None, :, :], x[:, safe_idx], jnp.zeros((), dtype))
    strided_nt_p = jnp.pad(strided_nt, ((0, 0), (0, 0), (0, T_pad - T)))

    # --- Hann window (forward direction); win_p=None -> frequency independent ---
    wl = actual_wl[0, 0]
    base = jnp.arange(N, dtype=dtype)[:, None] - idx_frac_p[None, :]       # (N, T_pad)
    tap = 0.5 - 0.5 * jnp.cos(2.0 * PI * (base + (wl - N + 1.0) / 2.0) / wl)
    mask1 = base >= jnp.ceil((N - 1.0 + wl) / 2.0)
    mask2 = base <= jnp.floor((N - 1.0 - wl) / 2.0)
    tap = jnp.where(mask1 | mask2, jnp.zeros((), dtype), tap)
    denom = jnp.maximum(jnp.sum(tap, axis=0, keepdims=True), 1e-30)        # guard /0
    tap = tap / denom
    tap = tap ** win_pow_p[0, 0]                                           # (N, T_pad)

    # --- fractional-shift phase per (freq, frame) ---
    freqs = jnp.arange(N, dtype=dtype)
    ang = 2.0 * PI * freqs[:, None] * idx_frac_p[None, :] / N              # (N, T_pad)
    shc, shs = jnp.cos(ang), jnp.sin(ang)

    # --- fused DFT matrix, rows = [cos block ; -sin block], (2N, N) ---
    nf = jnp.arange(N, dtype=dtype)
    ang2 = 2.0 * PI * nf[:, None] * nf[None, :] / N
    dft_lhs = jnp.concatenate([jnp.cos(ang2), -jnp.sin(ang2)], axis=0)     # (2N, N)

    eps = float(jnp.finfo(dtype).eps)
    kernel = partial(_dstft_kernel, N, F, float(pow), eps, bool(use_bf16_matmul))

    grid = (B, T_pad // tT)
    real_full, imag_full, spec_full = pl.pallas_call(
        kernel,
        out_shape=(jax.ShapeDtypeStruct((B, N, T_pad), dtype),
                   jax.ShapeDtypeStruct((B, N, T_pad), dtype),
                   jax.ShapeDtypeStruct((B, F, T_pad), dtype)),
        grid_spec=pltpu.PrefetchScalarGridSpec(
            num_scalar_prefetch=0,
            grid=grid,
            in_specs=[
                pl.BlockSpec((1, N, tT), lambda b, t: (b, 0, t)),   # framed x
                pl.BlockSpec((N, tT), lambda b, t: (0, t)),         # tap window
                # grid-invariant DFT matrix (copied once; footprint is tiny so
                # default double-buffering costs ~2*2N*N*4 bytes only)
                pl.BlockSpec((2 * N, N), lambda b, t: (0, 0)),
                pl.BlockSpec((N, tT), lambda b, t: (0, t)),         # shift cos
                pl.BlockSpec((N, tT), lambda b, t: (0, t)),         # shift sin
            ],
            out_specs=[
                pl.BlockSpec((1, N, tT), lambda b, t: (b, 0, t)),
                pl.BlockSpec((1, N, tT), lambda b, t: (b, 0, t)),
                pl.BlockSpec((1, F, tT), lambda b, t: (b, 0, t)),
            ],
        ),
        compiler_params=pltpu.CompilerParams(
            dimension_semantics=("parallel", "parallel"),
            vmem_limit_bytes=32 * 1024 * 1024),
    )(strided_nt_p, tap, dft_lhs, shc, shs)

    # --- outputs already in the PyTorch convention (B, N, T) / (B, F, T) ---
    real_bnt = real_full[:, :, :T]
    imag_bnt = imag_full[:, :, :T]
    spec_bft = spec_full[:, :, :T]
    stft = real_bnt + 1j * imag_bnt                    # complex assembled in glue
    # TODO(synk): phase via arctan2 kept in glue (no verified Mosaic lowering path).
    phase = jnp.arctan2(imag_bnt[:, :F], real_bnt[:, :F])           # (B, F, T)
    return spec_bft, stft, real_bnt, imag_bnt, phase, (strided_nt, tap[:, :T], idx_frac)


def _reference_stft(strided_nt, tap_nt, idx_frac, N):
    """Pure-jnp mirror of the torch stft() math for a correctness check.

    strided_nt: (B, N_sample, T), tap_nt: (N_sample, T), returns (B, N_freq, T).
    """
    n = jnp.arange(N, dtype=jnp.float32)
    shift = jnp.exp(2j * PI * (n[:, None] * idx_frac[None, :]) / N)         # (Nf, T)
    coeff = jnp.exp(-2j * PI * (n[:, None] * n[None, :]) / N)               # (Nf, Nn)
    xw = strided_nt.astype(jnp.complex64) * tap_nt[None, :, :]              # (B, Nn, T)
    stft = jnp.einsum('fn,bnt->bft', coeff, xw) * shift[None, :, :]         # (B, Nf, T)
    return stft


if __name__ == "__main__":
    key = jax.random.PRNGKey(0)
    B, L = 2, 263
    support, stride, win_length = 16, 8, 12.0
    x = jax.random.normal(key, (B, L), dtype=jnp.float32)

    spec, stft, real, imag, phase, aux = dstft_forward(
        x, support=support, stride=stride, win_length=win_length)
    jax.block_until_ready((spec, stft, real, imag, phase))

    # sanity check against a pure-JAX mirror of the torch math
    strided_nt, tap_nt, idx_frac = aux
    stft_ref = _reference_stft(strided_nt, tap_nt, idx_frac, support)
    F = 1 + support // 2
    eps = float(jnp.finfo(jnp.float32).eps)
    assert jnp.allclose(stft.real, stft_ref.real, atol=1e-4, rtol=1e-4)
    assert jnp.allclose(stft.imag, stft_ref.imag, atol=1e-4, rtol=1e-4)
    assert jnp.allclose(spec, jnp.abs(stft_ref)[:, :F] + eps, atol=1e-4, rtol=1e-4)

    print("KERNEL_OK")
</pallas_src>

<mosaic_0001>
module attributes {stable_mosaic.version = 11 : i64} {
  func.func @_dstft_kernel(%arg0: i32, %arg1: i32, %arg2: memref<1x16x128xf32, #tpu.memory_space<vmem>>, %arg3: memref<16x128xf32, #tpu.memory_space<vmem>>, %arg4: memref<32x16xf32, #tpu.memory_space<vmem>>, %arg5: memref<16x128xf32, #tpu.memory_space<vmem>>, %arg6: memref<16x128xf32, #tpu.memory_space<vmem>>, %arg7: memref<1x16x128xf32, #tpu.memory_space<vmem>>, %arg8: memref<1x16x128xf32, #tpu.memory_space<vmem>>, %arg9: memref<1x9x128xf32, #tpu.memory_space<vmem>>) attributes {dimension_semantics = [#tpu.dimension_semantics<parallel>, #tpu.dimension_semantics<parallel>], iteration_bounds = array<i64: 2, 1>, scalar_prefetch = 0 : i64, scratch_operands = 0 : i64, tpu.core_type = #tpu.core_type<tc>, window_params = [{transform_indices = @transform_0, window_bounds = array<i64: 1, 16, 128>}, {transform_indices = @transform_1, window_bounds = array<i64: 16, 128>}, {pipeline_mode = #tpu.pipeline_mode<synchronous>, transform_indices = @transform_2, window_bounds = array<i64: 32, 16>}, {transform_indices = @transform_3, window_bounds = array<i64: 16, 128>}, {transform_indices = @transform_4, window_bounds = array<i64: 16, 128>}, {transform_indices = @transform_5, window_bounds = array<i64: 1, 16, 128>}, {transform_indices = @transform_6, window_bounds = array<i64: 1, 16, 128>}, {transform_indices = @transform_7, window_bounds = array<i64: 1, 9, 128>}]} {
    %c0 = arith.constant 0 : index
    %c0_0 = arith.constant 0 : index
    %c0_1 = arith.constant 0 : index
    %0 = vector.load %arg2[%c0, %c0_0, %c0_1] : memref<1x16x128xf32, #tpu.memory_space<vmem>>, vector<1x16x128xf32>
    %1 = vector.shape_cast %0 : vector<1x16x128xf32> to vector<16x128xf32>
    %c0_2 = arith.constant 0 : index
    %c0_3 = arith.constant 0 : index
    %2 = vector.load %arg3[%c0_2, %c0_3] : memref<16x128xf32, #tpu.memory_space<vmem>>, vector<16x128xf32>
    %3 = arith.mulf %1, %2 : vector<16x128xf32>
    %c0_4 = arith.constant 0 : index
    %c0_5 = arith.constant 0 : index
    %4 = vector.load %arg4[%c0_4, %c0_5] : memref<32x16xf32, #tpu.memory_space<vmem>>, vector<32x16xf32>
    %cst = arith.constant dense<0.000000e+00> : vector<32x128xf32>
    %5 = tpu.matmul %4, %3, %cst {dimension_numbers = #tpu.dot_dimension_numbers<[1], [0], [0], [1], [0, 0, 1, 1], [], []>} : vector<32x16xf32>, vector<16x128xf32>, vector<32x128xf32> -> vector<32x128xf32>
    %6 = vector.extract_strided_slice %5 {offsets = [0, 0], sizes = [16, 128], strides = [1, 1]} : vector<32x128xf32> to vector<16x128xf32>
    %7 = vector.extract_strided_slice %5 {offsets = [16, 0], sizes = [16, 128], strides = [1, 1]} : vector<32x128xf32> to vector<16x128xf32>
    %c0_6 = arith.constant 0 : index
    %c0_7 = arith.constant 0 : index
    %8 = vector.load %arg5[%c0_6, %c0_7] : memref<16x128xf32, #tpu.memory_space<vmem>>, vector<16x128xf32>
    %c0_8 = arith.constant 0 : index
    %c0_9 = arith.constant 0 : index
    %9 = vector.load %arg6[%c0_8, %c0_9] : memref<16x128xf32, #tpu.memory_space<vmem>>, vector<16x128xf32>
    %10 = arith.mulf %6, %8 : vector<16x128xf32>
    %11 = arith.mulf %7, %9 : vector<16x128xf32>
    %12 = arith.subf %10, %11 : vector<16x128xf32>
    %13 = arith.mulf %6, %9 : vector<16x128xf32>
    %14 = arith.mulf %7, %8 : vector<16x128xf32>
    %15 = arith.addf %13, %14 : vector<16x128xf32>
    %c0_10 = arith.constant 0 : index
    %c0_11 = arith.constant 0 : index
    %c0_12 = arith.constant 0 : index
    %16 = vector.load %arg7[%c0_10, %c0_11, %c0_12] : memref<1x16x128xf32, #tpu.memory_space<vmem>>, vector<1x16x128xf32>
    %17 = vector.shape_cast %16 : vector<1x16x128xf32> to vector<16x128xf32>
    %18 = vector.shape_cast %12 : vector<16x128xf32> to vector<1x16x128xf32>
    tpu.vector_store %arg7[%c0_10, %c0_11, %c0_12], %18 {strides = array<i32>} : memref<1x16x128xf32, #tpu.memory_space<vmem>>, vector<1x16x128xf32>,
    %c0_13 = arith.constant 0 : index
    %c0_14 = arith.constant 0 : index
    %c0_15 = arith.constant 0 : index
    %19 = vector.load %arg8[%c0_13, %c0_14, %c0_15] : memref<1x16x128xf32, #tpu.memory_space<vmem>>, vector<1x16x128xf32>
    %20 = vector.shape_cast %19 : vector<1x16x128xf32> to vector<16x128xf32>
    %21 = vector.shape_cast %15 : vector<16x128xf32> to vector<1x16x128xf32>
    tpu.vector_store %arg8[%c0_13, %c0_14, %c0_15], %21 {strides = array<i32>} : memref<1x16x128xf32, #tpu.memory_space<vmem>>, vector<1x16x128xf32>,
    %22 = arith.mulf %12, %12 : vector<16x128xf32>
    %23 = arith.mulf %15, %15 : vector<16x128xf32>
    %24 = arith.addf %22, %23 : vector<16x128xf32>
    %25 = math.sqrt %24 : vector<16x128xf32>
    %26 = vector.extract_strided_slice %25 {offsets = [0, 0], sizes = [9, 128], strides = [1, 1]} : vector<16x128xf32> to vector<9x128xf32>
    %cst_16 = arith.constant 1.1920929E-7 : f32
    %27 = vector.broadcast %cst_16 : f32 to vector<9x128xf32>
    %28 = arith.addf %26, %27 : vector<9x128xf32>
    %c0_17 = arith.constant 0 : index
    %c0_18 = arith.constant 0 : index
    %c0_19 = arith.constant 0 : index
    %29 = vector.load %arg9[%c0_17, %c0_18, %c0_19] : memref<1x9x128xf32, #tpu.memory_space<vmem>>, vector<1x9x128xf32>
    %30 = vector.shape_cast %29 : vector<1x9x128xf32> to vector<9x128xf32>
    %31 = vector.shape_cast %28 : vector<9x128xf32> to vector<1x9x128xf32>
    tpu.vector_store %arg9[%c0_17, %c0_18, %c0_19], %31 {strides = array<i32>} : memref<1x9x128xf32, #tpu.memory_space<vmem>>, vector<1x9x128xf32>,
    return
  }
  func.func @transform_0(%arg0: i32, %arg1: i32) -> (i32, i32, i32) {
    %c0_i32 = arith.constant 0 : i32
    %c0_i32_0 = arith.constant 0 : i32
    return %arg0, %c0_i32, %arg1 : i32, i32, i32
  }
  func.func @transform_1(%arg0: i32, %arg1: i32) -> (i32, i32) {
    %c0_i32 = arith.constant 0 : i32
    %c0_i32_0 = arith.constant 0 : i32
    return %c0_i32, %arg1 : i32, i32
  }
  func.func @transform_2(%arg0: i32, %arg1: i32) -> (i32, i32) {
    %c0_i32 = arith.constant 0 : i32
    %c0_i32_0 = arith.constant 0 : i32
    %c0_i32_1 = arith.constant 0 : i32
    return %c0_i32, %c0_i32_0 : i32, i32
  }
  func.func @transform_3(%arg0: i32, %arg1: i32) -> (i32, i32) {
    %c0_i32 = arith.constant 0 : i32
    %c0_i32_0 = arith.constant 0 : i32
    return %c0_i32, %arg1 : i32, i32
  }
  func.func @transform_4(%arg0: i32, %arg1: i32) -> (i32, i32) {
    %c0_i32 = arith.constant 0 : i32
    %c0_i32_0 = arith.constant 0 : i32
    return %c0_i32, %arg1 : i32, i32
  }
  func.func @transform_5(%arg0: i32, %arg1: i32) -> (i32, i32, i32) {
    %c0_i32 = arith.constant 0 : i32
    %c0_i32_0 = arith.constant 0 : i32
    return %arg0, %c0_i32, %arg1 : i32, i32, i32
  }
  func.func @transform_6(%arg0: i32, %arg1: i32) -> (i32, i32, i32) {
    %c0_i32 = arith.constant 0 : i32
    %c0_i32_0 = arith.constant 0 : i32
    return %arg0, %c0_i32, %arg1 : i32, i32, i32
  }
  func.func @transform_7(%arg0: i32, %arg1: i32) -> (i32, i32, i32) {
    %c0_i32 = arith.constant 0 : i32
    %c0_i32_0 = arith.constant 0 : i32
    return %arg0, %c0_i32, %arg1 : i32, i32, i32
  }
}

</mosaic_0001>

<bundles_post_ra>
// kernel: tpu_custom_call.1
= control target key start
LH: loop header
LB: loop body
LE: loop exit
PB: predicated region body
PF: predicated region fallthrough
CT: control target
= control target key end

     0   :  { %s1281_s0 = inlined_call_operand.vmem [shape: f32[2,16,128], index: 0, kind: input, shape index: {}]   ;;  %s1282_s1 = inlined_call_operand.vmem [shape: f32[16,128], index: 1, kind: input, shape index: {}]   ;;  %s1283_s2 = inlined_call_operand.vmem [shape: f32[32,16], index: 2, kind: input, shape index: {}]   ;;  %s1284_s3 = inlined_call_operand.hbm [shape: f32[16,128], index: 3, kind: input, shape index: {}]   ;;  %s1285_s4 = inlined_call_operand.hbm [shape: f32[16,128], index: 4, kind: input, shape index: {}]   ;;  %s1286_s5 = inlined_call_operand.hbm [shape: f32[2,16,128], index: 5, kind: output, shape index: {0}]   ;;  %s1287_s6 = inlined_call_operand.hbm [shape: f32[2,16,128], index: 6, kind: output, shape index: {1}]   ;;  %s1288_s7 = inlined_call_operand.vmem [shape: f32[2,9,128], index: 7, kind: output, shape index: {2}]  }
   0x1   :  { %1290 = sst [smem:[#allocation14_spill]] %s1281_s0 }
   0x2   :  { %1291 = sst [smem:[#allocation15_spill]] %s1282_s1 }
   0x3   :  { %1292 = sst [smem:[#allocation16_spill]] %s1283_s2 }
   0x4   :  { %13 = vsyncpa [#allocation3], 0 }
   0x5   :  { %14 = vsyncpa [#allocation6], 0 }
   0x6   :  { %15 = vsyncpa [#allocation4], 0 }
   0x7   :  { %17 = vsyncpa [#allocation4 + $0x1], 0 }
   0x8   :  { %18 = vsyncpa [#allocation9], 0 }
   0x9   :  { %20 = vsyncpa [#allocation9 + $0x1], 0  ;;  %s1100_s24 = smov 0   ;;  %s1102_s25 = smov 0  }
   0xa   :  { %s1104_s26 = smov 0   ;;  %s1106_s27 = smov 0  }
   0xb   :  { %s1108_s28 = smov 0   ;;  %s1110_s29 = smov 0  }
   0xc LB: > { %s747_s30 = sadd.s32 4294967295, %s1052_s29   ;;  %s748_s8 = sadd.s32 4294967294, %s1052_s29   ;;  %s1052_s29 = sphi %s1110_s29, %s26_s29   ;;  %s1048_s28 = sphi %s1108_s28, %s1305_s28   ;;  %s1044_s27 = sphi %s1106_s27, %s1304_s27   ;;  %s1040_s26 = sphi %s1104_s26, %s1303_s26   ;;  %s1036_s25 = sphi %s1102_s25, %s1302_s25   ;;  %s1032_s24 = sphi %s1100_s24, %s1301_s24  }
   0xd   : > { %s38_s9 = sadd.s32 1, %s1048_s28  ;;  %s174_s10 = sadd.s32 1, %s1040_s26 }
   0xe   : > { %p40_p0 = scmp.ge.s32.totalorder %s38_s9, 2  ;;  %p184_p1 = scmp.ne.s32.totalorder %s1040_s26, %s1036_s25 }
   0xf   : > { %p185_p2 = scmp.eq.s32.totalorder %s747_s30, 1  ;;  %p190_p3 = scmp.ne.s32.totalorder %s1036_s25, %s1032_s24 }
  0x10   : > { %s1307_s9 = smov (%p40_p0, %s38_s9), 0  ;;  %p191_p5 = scmp.eq.s32.totalorder %s748_s8, 1 }
  0x11   : > { %p1140_p4 = por %p185_p2, %p184_p1  ;;  %s169_s12 = ssub.s32 %s1048_s28, %s1307_s9 }
  0x12   : > { %p749_p6 = scmp.ge.s32.totalorder %s1052_s29, 1  ;;  %p172_p7 = scmp.eq.s32.totalorder %s169_s12, 0 }
  0x13   : > { %p1147_p8 = por %p191_p5, %p190_p3  ;;  %p254_p9 = scmp.lt.s32.totalorder %s1052_s29, 3 }
  0x14   : > { %s1153_s14 = scalar_select %p172_p7, %s1040_s26, %s174_s10  }
  0x15   : > { %p1155_p10 = pnand %p749_p6, %p254_p9  ;;  %p1159_p11 = scmp.eq.s32.totalorder %s747_s30, 0 }
  0x16   : > { %s277_s19 = sshll.u32 %s1284_s3, 4  ;;  %s1054_s20 = smov [#allocation2]   ;;  %s278_s19 = int_to_ptr.hbm [resolvable:$true] %s277_s19 }
  0x17   : > { %p797_p12 = pneg %p1155_p10  ;;  %s279_s21 = sshll.u32 %s1054_s20, 4  ;;  %s280_s21 = int_to_ptr.vmem [resolvable:$true] %s279_s21 }
  0x18   : > { %s293_s30 = sshll.u32 %s1285_s4, 4  ;;  %s1055_s8 = smov 128   ;;  %s294_s30 = int_to_ptr.hbm [resolvable:$true] %s293_s30 }
  0x19   : > { %p798_p13 = pnand %p1159_p11, %p797_p12  ;;  %s1056_s10 = smov 8  }
  0x1a   : > { %s1057_s12 = smov [#allocation5]   ;;  %322 = sbr.rel (%p1155_p10) target bundleno = 222 (0xde), region = 40 }
  0x1b   : > { %800 = dma.hbm_to_vmem [thread:$0]  (!%p798_p13), %s278_s19, 256, %s280_s21, [#allocation3], %s1055_s8, %s1055_s8, %s1056_s10  }
  0x1c   : > { %s295_s17 = sshll.u32 %s1057_s12, 4  ;;  %s296_s17 = int_to_ptr.vmem [resolvable:$true] %s295_s17 }
  0x1d   : > { %803 = dma.hbm_to_vmem [thread:$0]  (!%p798_p13), %s294_s30, 256, %s296_s17, [#allocation6], %s1055_s8, %s1055_s8, %s1056_s10  }
  0x1f   : > { %1015 = dma.done.wait (%p1159_p11), [#allocation3], 256  }
  0x20   : > { %1017 = vsyncadd (%p1159_p11), [#allocation3], 4294967040 }
  0x21   : > { %1019 = dma.done.wait (%p1159_p11), [#allocation6], 256  }
  0x22   : > { %1021 = vsyncadd (%p1159_p11), [#allocation6], 4294967040  ;;  %p380_p0 = scmp.lt.s32.totalorder %s1044_s27, 1  ;;  %s1297_s0 = sld [smem:[#allocation14_spill]]  ;;  %vm410_vm0 = vcmask 130048   ;;  %v452_v10 = vld [vmem:[#allocation2] sm:$0xff] }
  0x23   : > { %s1298_s1 = sld [smem:[#allocation15_spill]]  ;;  %s1212_s23 = sand.u32 1, %s1036_s25   ;;  %v454_v12 = vld [vmem:[#allocation5] sm:$0xff]  ;;  %v453_v14 = vld [vmem:[#allocation2 + $0x8] sm:$0xff]  ;;  %v455_v15 = vld [vmem:[#allocation5 + $0x8] sm:$0xff] }
  0x24   : > { %s1185_s18 = scalar_select %p380_p0, %s1044_s27, 1 }
  0x25   : > { %s1299_s2 = sld [smem:[#allocation16_spill]]  ;;  %s757_s16 = sshll.u32 %s1212_s23, 4 }
  0x26   : > { %s1289_s15 = sshll.u32 %s1185_s18, 4  ;;  %s777_s30 = sshll.u32 %s1044_s27, 4 }
  0x27   : > { %s532_s12 = scalar_lea.hbm %s1286_s5, %s777_s30  ;;  %s550_s20 = scalar_lea.hbm %s1287_s6, %s777_s30 }
  0x28   : > { %s387_s21 = scalar_lea.vmem %s1297_s0, %s1289_s15  ;;  %s369_s22 = scalar_lea.vmem [#allocation8], %s757_s16 }
  0x29   : > { %v401_v0 = vld [vmem:[%s387_s21 + $0x8] sm:$0xff]  ;;  %v400_v2 = vld [vmem:[%s387_s21] sm:$0xff]  ;;  %s362_s21 = scalar_lea.vmem [#allocation7], %s757_s16  ;;  %s551_s15 = sshll.u32 %s369_s22, 4  ;;  %s1224_s15 = int_to_ptr.vmem [resolvable:$true] %s551_s15 }
  0x2a   : > { %v403_v1 = vld [vmem:[%s1298_s1 + $0x8] sm:$0xff]  ;;  %v402_v4 = vld [vmem:[%s1298_s1] sm:$0xff]  ;;  %s533_s27 = sshll.u32 %s362_s21, 4  ;;  %s535_s0 = sshll.u32 %s532_s12, 4  ;;  %s1222_s27 = int_to_ptr.vmem [resolvable:$true] %s533_s27  ;;  %s536_s0 = int_to_ptr.hbm [resolvable:$true] %s535_s0 }
  0x2b   : > { %v405_v3 = vmul.f32 %v403_v1, %v401_v0  ;;  %v404_v5 = vmul.f32 %v402_v4, %v400_v2  ;;  %v408_v6 = vld [vmem:[%s1299_s2 + $0x10] sm:$0xff]  ;;  %v409_v7 = vld [vmem:[%s1299_s2 + $0x18] sm:$0xff]  ;;  %v406_v8 = vld [vmem:[%s1299_s2] sm:$0xff]  ;;  %s553_s1 = sshll.u32 %s550_s20, 4  ;;  %s507_s16 = scalar_lea.sflag [#allocation4], %s1212_s23  ;;  %s1226_s1 = int_to_ptr.hbm [resolvable:$true] %s553_s1 }
  0x2c   : > { %v407_v9 = vld [vmem:[%s1299_s2 + $0x8] sm:$0xff]  ;;  %s948_s30 = sshra.s32 %s536_s0, 4  ;;  %s954_s17 = scalar_lea.hbm %s1286_s5, 32  ;;  %s949_s30 = int_to_ptr.hbm [resolvable:$true] %s948_s30 }
  0x2d   : > { %780 = vmatpush.msra.mxu2 %v405_v3  ;;  %781 = vmatpush.msra.mxu3 %v405_v3  ;;  %s950_s8 = scalar_lea.hbm %s949_s30, 16  ;;  %p955_p5 = scmp.lt.s32.totalorder %s949_s30, %s1286_s5 }
  0x2e   : > { %437 = vmatpush.msra.mxu0 %v405_v3  ;;  %779 = vmatpush.msra.mxu1 %v405_v3  ;;  %p951_p1 = scmp.ne.s32.totalorder %s949_s30, %s950_s8  ;;  %p956_p6 = scmp.lt.s32.totalorder %s954_s17, %s950_s8 }
  0x2f   : > { %783 = vmatpush.msra.mxu2 %v404_v5  ;;  %784 = vmatpush.msra.mxu3 %v404_v5 }
  0x30   : > { %765 = vmatmul.msk.f32.vlgmr.msra.gmra.mxu2 %vm410_vm0, %v408_v6  ;;  %766 = vmatmul.msk.f32.vlgmr.msra.gmra.mxu3 %vm410_vm0, %v409_v7  ;;  %p952_p2 = pnand %p951_p1, %p1140_p4  ;;  %p957_p7 = por %p956_p6, %p955_p5 }
  0x31   : > { %438 = vmatpush.msra.mxu0 %v404_v5  ;;  %782 = vmatpush.msra.mxu1 %v404_v5 }
  0x32   : > { %763 = vmatmul.msk.f32.vlgmr.msra.gmra.mxu0 %vm410_vm0, %v406_v8  ;;  %764 = vmatmul.msk.f32.vlgmr.msra.gmra.mxu1 %vm410_vm0, %v407_v9  ;;  %p953_p3 = pneg %p952_p2 }
  0x34   : > { %p958_p9 = pnand %p957_p7, %p953_p3 }
  0xaf   : > { %v440_v11 = vpop.f32.mrf.mxu0  ;;  %v443_v13 = vpop.f32.mrf.mxu1 }
  0xb0   : > { %v456_v16 = vmul.f32 %v452_v10, %v440_v11  ;;  %v462_v17 = vmul.f32 %v454_v12, %v440_v11  ;;  %v457_v18 = vmul.f32 %v453_v14, %v443_v13  ;;  %v463_v19 = vmul.f32 %v455_v15, %v443_v13 }
  0xb3   : > { %v446_v20 = vpop.f32.mrf.mxu2  ;;  %v449_v21 = vpop.f32.mrf.mxu3 }
  0xb4   : > { %v458_v22 = vmul.f32 %v454_v12, %v446_v20  ;;  %v464_v23 = vmul.f32 %v452_v10, %v446_v20  ;;  %v459_v24 = vmul.f32 %v455_v15, %v449_v21  ;;  %v465_v25 = vmul.f32 %v453_v14, %v449_v21 }
  0xb6   : > { %v460_v26 = vsub.f32 %v456_v16, %v458_v22  ;;  %v466_v27 = vadd.f32 %v464_v23, %v462_v17  ;;  %v461_v28 = vsub.f32 %v457_v18, %v459_v24  ;;  %v467_v29 = vadd.f32 %v465_v25, %v463_v19 }
  0xb8   : > { %468 = vst [vmem:[%s362_s21] sm:$0xff] %v460_v26  ;;  %v472_v30 = vmul.f32 %v460_v26, %v460_v26  ;;  %v474_v31 = vmul.f32 %v466_v27, %v466_v27  ;;  %v473_v32 = vmul.f32 %v461_v28, %v461_v28  ;;  %v475_v33 = vmul.f32 %v467_v29, %v467_v29 }
  0xb9   : > { %470 = vst [vmem:[%s369_s22] sm:$0xff] %v466_v27 }
  0xba   : > { %v476_v34 = vadd.f32 %v474_v31, %v472_v30  ;;  %469 = vst [vmem:[%s362_s21 + $0x8] sm:$0xff] %v461_v28  ;;  %v477_v35 = vadd.f32 %v475_v33, %v473_v32 }
  0xbb   : > { %471 = vst [vmem:[%s369_s22 + $0x8] sm:$0xff] %v467_v29 }
  0xbc   : > { %870 = vrsqrt.f32 %v476_v34 }
  0xbd   : > { %961 = shalt.err (!%p958_p9)
}
  0xbe   : > { %s1058_s21 = smov 128   ;;  %s1059_s22 = smov 8   ;;  %872 = vrsqrt.f32 %v477_v35 }
  0xbf   : > { %793 = dma.vmem_to_hbm [thread:$0]  (%p1140_p4), %s1222_s27, 256, %s536_s0, %s507_s16, %s1058_s21, %s1058_s21, %s1059_s22  }
  0xc0   : > { %s512_s10 = scalar_lea.sflag [#allocation9], %s1212_s23  ;;  %s976_s12 = sshra.s32 %s1226_s1, 4  ;;  %s977_s12 = int_to_ptr.hbm [resolvable:$true] %s976_s12 }
  0xc1   : > { %s978_s2 = scalar_lea.hbm %s977_s12, 16  ;;  %s982_s17 = scalar_lea.hbm %s1287_s6, 32 }
  0xc2   : > { %p979_p10 = scmp.ne.s32.totalorder %s977_s12, %s978_s2  ;;  %p983_p13 = scmp.lt.s32.totalorder %s977_s12, %s1287_s6 }
  0xc3   : > { %p984_p0 = scmp.lt.s32.totalorder %s982_s17, %s978_s2 }
  0xc4   : > { %p980_p11 = pnand %p979_p10, %p1140_p4 }
  0xc5   : > { %p985_p1 = por %p984_p0, %p983_p13 }
  0xc6   : > { %p981_p12 = pneg %p980_p11 }
  0xc8   : > { %p986_p2 = pnand %p985_p1, %p981_p12 }
  0xca   : > { %989 = shalt.err (!%p986_p2)
}
  0xcb   : > { %794 = dma.vmem_to_hbm [thread:$0]  (%p1140_p4), %s1224_s15, 256, %s1226_s1, %s512_s10, %s1058_s21, %s1058_s21, %s1059_s22   ;;  %v871_v36 = vpop.eup %870  ;;  %vm485_vm1 = vcmp.eq.f32.partialorder %v476_v34, inf  ;;  %v488_v49 = vand.u32 2147483648, %v476_v34  ;;  %vm487_vm2 = vcmp.eq.f32.partialorder %v476_v34, 0.0  ;;  %vm497_vm3 = vcmp.eq.f32.partialorder %v477_v35, inf }
  0xcc   : > { %v873_v37 = vpop.eup %872  ;;  %v479_v38 = vmul.f32 %v871_v36, %v476_v34  ;;  %v500_v52 = vand.u32 2147483648, %v477_v35  ;;  %s1300_s0 = sshll.u32 %s1185_s18, 4  ;;  %vm499_vm4 = vcmp.eq.f32.partialorder %v477_v35, 0.0 }
  0xcd   : > { %v491_v39 = vmul.f32 %v873_v37, %v477_v35  ;;  %s399_s11 = scalar_lea.vmem %s1288_s7, %s1300_s0 }
  0xce   : > { %v480_v40 = vmul.f32 %v871_v36, %v479_v38 }
  0xcf   : > { %v492_v41 = vmul.f32 %v873_v37, %v491_v39 }
  0xd0   : > { %v481_v42 = vmul.f32 0.5, %v480_v40 }
  0xd1   : > { %v493_v43 = vmul.f32 0.5, %v492_v41 }
  0xd2   : > { %v482_v44 = vsub.f32 1.5, %v481_v42 }
  0xd3   : > { %v494_v45 = vsub.f32 1.5, %v493_v43 }
  0xd4   : > { %v483_v46 = vmul.f32 %v871_v36, %v482_v44 }
  0xd5   : > { %v495_v47 = vmul.f32 %v873_v37, %v494_v45 }
  0xd6   : > { %v484_v48 = vmul.f32 %v483_v46, %v476_v34 }
  0xd7   : > { %v496_v50 = vmul.f32 %v495_v47, %v477_v35 }
  0xd8   : > { %v486_v51 = vsel %vm485_vm1, %v476_v34, %v484_v48 }
  0xd9   : > { %v489_v53 = vsel %vm487_vm2, %v488_v49, %v486_v51  ;;  %v498_v54 = vsel %vm497_vm3, %v477_v35, %v496_v50 }
  0xda   : > { %v502_v55 = vadd.f32 1.1920929e-07, %v489_v53  ;;  %v501_v56 = vsel %vm499_vm4, %v500_v52, %v498_v54 }
  0xdb   : > { %v503_v57 = vadd.f32 1.1920929e-07, %v501_v56 }
  0xdc   : > { %504 = vst [vmem:[%s399_s11] sm:$0xff] %v502_v55 }
  0xdd   : > { %505 = vst [vmem:[%s399_s11 + $0x8] sm:$0x1] %v503_v57 }
  0xde PF: > { %p815_p4 = scmp.ge.s32.totalorder %s1052_s29, 2  ;;  %s571_s15 = sand.u32 1, %s1032_s24  }
  0xdf   : > { %s572_s18 = scalar_lea.sflag [#allocation4], %s571_s15 }
  0xe0   : > { %p805_p3 = pnand %p815_p4, %p1147_p8 }
  0xe2   : > { %p806_p5 = pneg %p805_p3 }
  0xe4   : > { %1023 = dma.done.wait (%p806_p5), %s572_s18, 256  }
  0xe5   : > { %1025 = vsyncadd (%p806_p5), %s572_s18, 4294967040  ;;  %s582_s23 = scalar_lea.sflag [#allocation9], %s571_s15 }
  0xe6   : > { %1027 = dma.done.wait (%p806_p5), %s582_s23, 256  }
  0xe7   : > { %1029 = vsyncadd (%p806_p5), %s582_s23, 4294967040  ;;  %s26_s29 = sadd.s32 1, %s1052_s29   ;;  %s1301_s24 = smov %s1036_s25 }
  0xe8   : > { %p23_p6 = scmp.ge.s32.totalorder %s26_s29, 4   ;;  %s1302_s25 = smov %s1040_s26 }
  0xe9   : > { %s1303_s26 = smov %s1153_s14  ;;  %s1304_s27 = smov %s1048_s28 }
  0xea   : > { %s1305_s28 = smov %s1307_s9  ;;  %25 = sbr.rel (!%p23_p6) target bundleno = 12 (0xc), region = 118 }
  0xef   :  { %599 = vsyncpa [#allocation3], 1 }
  0xf0   :  { %601 = vsyncpa [#allocation3 + $0x1], 1 }
  0xf1   :  { %602 = vsyncpa [#allocation6], 1 }
  0xf2   :  { %603 = vsyncpa [#allocation4], 1 }
  0xf3   :  { %605 = vsyncpa [#allocation4 + $0x1], 1 }
  0xf4   :  { %606 = vsyncpa [#allocation9], 1 }
  0xf5   :  { %608 = vsyncpa [#allocation9 + $0x1], 1 }

</bundles_post_ra>
